<compile_context>
chip_gen: v7x
topology: tpu7x:2x2x1
jax: 0.10.0
libtpu: 0.0.40
codegen_flags: <defaults>
</compile_context>

<pallas_src>
import jax
import jax.numpy as jnp
from jax.experimental import pallas as pl
from jax.experimental.pallas import tpu as pltpu


def _pattern_tcn_kernel(z_ref, w_ref, bias_ref, o_ref):
    """One (batch, lane-tile) step of the fused conv(3,1)+mean as a single matmul.

    z_ref   : (C1*T, nblk)  activation slab; lane axis = tile of N
    w_ref   : (C2, C1*T)    folded per-timestep conv weights (grid-resident)
    bias_ref: (C2, 1)       per-batch effective bias (conv bias + holiday term)
    o_ref   : (C2, nblk)    channel-major, lane-dense output slab
    """
    acc = jnp.dot(w_ref[...], z_ref[...], preferred_element_type=jnp.float32)
    o_ref[...] = (acc + bias_ref[...]).astype(o_ref.dtype)


def _lane_tile(n_pad, batch):
    """Largest lane tile (<=2048) giving >=4 grid steps (>=2 fallback).

    n_pad is always a multiple of 128.  Keeping >=2 parallel steps matters on
    v7x (2 TensorCores); >=4 also hides DMA behind compute on v5e/v6e.
    """
    for min_steps in (4, 2, 1):
        for cand in (2048, 1024, 512, 256, 128):
            if n_pad % cand == 0 and batch * (n_pad // cand) >= min_steps:
                return cand
    return 128


def pattern_tcn(Z1, holiday_flag, W, b):
    """Z1: (B, C1, T, N) f32; holiday_flag: (B,); W: (C2, C1+1, 3, 1); b: (C2,)."""
    B, C1, T, N = Z1.shape
    C2 = W.shape[0]
    dt = Z1.dtype
    inv_t = 1.0 / T

    # ---- wrapper-side parameter folding (batch independent, done once) ----
    Wk = W[:, :, :, 0].astype(dt)                                   # (C2, C1+1, 3)
    W0, W1, W2 = Wk[:, :C1, 0], Wk[:, :C1, 1], Wk[:, :C1, 2]        # (C2, C1)
    Wh0, Wh1, Wh2 = Wk[:, C1, 0], Wk[:, C1, 1], Wk[:, C1, 2]        # (C2,)

    tau = jnp.arange(T, dtype=dt)
    m0 = (tau <= T - 2).astype(dt)          # tap k=0 (t-1) touches tau in [0, T-2]
    m2 = (tau >= 1).astype(dt)              # tap k=2 (t+1) touches tau in [1, T-1]
    coef = (W0[:, :, None] * m0[None, None, :]
            + W1[:, :, None]
            + W2[:, :, None] * m2[None, None, :]) * inv_t           # (C2, C1, T)
    W_full = coef.reshape(C2, C1 * T)

    hol_coef = (Wh0 * (T - 1) + Wh1 * T + Wh2 * (T - 1)) * inv_t    # (C2,)
    bias_eff = (b.astype(dt)[None, :]
                + holiday_flag.astype(dt)[:, None] * hol_coef[None, :])
    bias_eff = bias_eff.reshape(B, C2, 1)                           # (B, C2, 1)

    # ---- free reshape; pad N to a lane multiple only when necessary ----
    Zf = Z1.reshape(B, C1 * T, N)
    N_pad = ((N + 127) // 128) * 128
    if N_pad != N:
        Zf = jnp.pad(Zf, ((0, 0), (0, 0), (0, N_pad - N)))

    nblk = _lane_tile(N_pad, B)
    grid = (B, N_pad // nblk)
    k = C1 * T

    grid_spec = pltpu.PrefetchScalarGridSpec(
        num_scalar_prefetch=0,
        grid=grid,
        in_specs=[
            pl.BlockSpec((pl.Squeezed(), k, nblk), lambda bi, j: (bi, 0, j)),
            pl.BlockSpec((C2, k), lambda bi, j: (0, 0)),            # resident weights
            pl.BlockSpec((pl.Squeezed(), C2, 1), lambda bi, j: (bi, 0, 0)),
        ],
        out_specs=pl.BlockSpec((pl.Squeezed(), C2, nblk), lambda bi, j: (bi, 0, j)),
    )

    bytes_accessed = 4 * (B * k * N_pad + B * C2 * N_pad + C2 * k + B * C2)
    out_cm = pl.pallas_call(
        _pattern_tcn_kernel,
        out_shape=jax.ShapeDtypeStruct((B, C2, N_pad), dt),
        grid_spec=grid_spec,
        compiler_params=pltpu.CompilerParams(
            dimension_semantics=("parallel", "parallel")),
        cost_estimate=pl.CostEstimate(
            flops=2 * B * C2 * k * N_pad,
            transcendentals=0,
            bytes_accessed=bytes_accessed),
    )(Zf, W_full, bias_eff)

    # (B, C2, N) -> (B, N, C2): one small layout pass (module spec output).
    return jnp.transpose(out_cm[:, :, :N], (0, 2, 1))


def pattern_tcn_ref(Z1, holiday_flag, W, b):
    """Pure-JAX reference matching the PyTorch forward exactly."""
    B, C1, T, N = Z1.shape
    wf = jnp.broadcast_to(holiday_flag.reshape(B, 1, 1, 1).astype(Z1.dtype),
                          (B, 1, T, N))
    x = jnp.concatenate([Z1, wf], axis=1)
    out = jax.lax.conv_general_dilated(
        x, W, window_strides=(1, 1), padding=((1, 1), (0, 0)),
        dimension_numbers=("NCHW", "OIHW", "NCHW"))
    out = out + b.reshape(1, -1, 1, 1)
    pooled = out.mean(axis=2)
    return jnp.transpose(pooled, (0, 2, 1))


def _run_case(key, B, hidden1, hidden2, T, N):
    Cin = hidden1 + 1
    k1, k2, k3, k4 = jax.random.split(key, 4)
    Z1 = jax.random.normal(k1, (B, hidden1, T, N), dtype=jnp.float32)
    holiday_flag = jax.random.bernoulli(k2, 0.5, (B,)).astype(jnp.float32)
    # Parameter shapes from nn.Conv2d(hidden1+1, hidden2, (3,1), padding=(1,0))
    W = 0.1 * jax.random.normal(k3, (hidden2, Cin, 3, 1), dtype=jnp.float32)
    b = 0.1 * jax.random.normal(k4, (hidden2,), dtype=jnp.float32)

    out = jax.block_until_ready(pattern_tcn(Z1, holiday_flag, W, b))
    ref = pattern_tcn_ref(Z1, holiday_flag, W, b)
    assert out.shape == (B, N, hidden2), out.shape
    assert jnp.allclose(out, ref, rtol=1e-5, atol=1e-5), (
        float(jnp.max(jnp.abs(out - ref))))


if __name__ == "__main__":
    key = jax.random.PRNGKey(0)
    ka, kb = jax.random.split(key)
    # Lane-aligned case: N=128, B=2 -> grid (2, 1), nblk=128 (two parallel steps).
    _run_case(ka, B=2, hidden1=4, hidden2=8, T=8, N=128)
    # Non-aligned case: N=96 exercises the zero-pad + slice path.
    _run_case(kb, B=2, hidden1=4, hidden2=8, T=8, N=96)
    print("KERNEL_OK")
</pallas_src>

<mosaic_0001>
module attributes {stable_mosaic.version = 11 : i64} {
  func.func @_pattern_tcn_kernel(%arg0: i32, %arg1: i32, %arg2: memref<1x32x128xf32, #tpu.memory_space<vmem>>, %arg3: memref<8x32xf32, #tpu.memory_space<vmem>>, %arg4: memref<1x8x1xf32, #tpu.memory_space<vmem>>, %arg5: memref<1x8x128xf32, #tpu.memory_space<vmem>>) attributes {dimension_semantics = [#tpu.dimension_semantics<parallel>, #tpu.dimension_semantics<parallel>], iteration_bounds = array<i64: 2, 1>, scalar_prefetch = 0 : i64, scratch_operands = 0 : i64, tpu.core_type = #tpu.core_type<tc>, window_params = [{transform_indices = @transform_0, window_bounds = array<i64: 1, 32, 128>}, {pipeline_mode = #tpu.pipeline_mode<synchronous>, transform_indices = @transform_1, window_bounds = array<i64: 8, 32>}, {transform_indices = @transform_2, window_bounds = array<i64: 1, 8, 1>}, {transform_indices = @transform_3, window_bounds = array<i64: 1, 8, 128>}]} {
    %c0 = arith.constant 0 : index
    %c0_0 = arith.constant 0 : index
    %0 = vector.load %arg3[%c0, %c0_0] : memref<8x32xf32, #tpu.memory_space<vmem>>, vector<8x32xf32>
    %c0_1 = arith.constant 0 : index
    %c0_2 = arith.constant 0 : index
    %c0_3 = arith.constant 0 : index
    %1 = vector.load %arg2[%c0_1, %c0_2, %c0_3] : memref<1x32x128xf32, #tpu.memory_space<vmem>>, vector<1x32x128xf32>
    %2 = vector.shape_cast %1 : vector<1x32x128xf32> to vector<32x128xf32>
    %cst = arith.constant dense<0.000000e+00> : vector<8x128xf32>
    %3 = tpu.matmul %0, %2, %cst {dimension_numbers = #tpu.dot_dimension_numbers<[1], [0], [0], [1], [0, 0, 1, 1], [], []>} : vector<8x32xf32>, vector<32x128xf32>, vector<8x128xf32> -> vector<8x128xf32>
    %c0_4 = arith.constant 0 : index
    %c0_5 = arith.constant 0 : index
    %c0_6 = arith.constant 0 : index
    %4 = vector.load %arg4[%c0_4, %c0_5, %c0_6] : memref<1x8x1xf32, #tpu.memory_space<vmem>>, vector<1x8x1xf32>
    %5 = vector.shape_cast %4 : vector<1x8x1xf32> to vector<8x1xf32>
    %6 = vector.broadcast %5 : vector<8x1xf32> to vector<8x128xf32>
    %7 = arith.addf %3, %6 : vector<8x128xf32>
    %c0_7 = arith.constant 0 : index
    %c0_8 = arith.constant 0 : index
    %c0_9 = arith.constant 0 : index
    %8 = vector.load %arg5[%c0_7, %c0_8, %c0_9] : memref<1x8x128xf32, #tpu.memory_space<vmem>>, vector<1x8x128xf32>
    %9 = vector.shape_cast %8 : vector<1x8x128xf32> to vector<8x128xf32>
    %10 = vector.shape_cast %7 : vector<8x128xf32> to vector<1x8x128xf32>
    tpu.vector_store %arg5[%c0_7, %c0_8, %c0_9], %10 {strides = array<i32>} : memref<1x8x128xf32, #tpu.memory_space<vmem>>, vector<1x8x128xf32>,
    return
  }
  func.func @transform_0(%arg0: i32, %arg1: i32) -> (i32, i32, i32) {
    %c0_i32 = arith.constant 0 : i32
    %c0_i32_0 = arith.constant 0 : i32
    return %arg0, %c0_i32, %arg1 : i32, i32, i32
  }
  func.func @transform_1(%arg0: i32, %arg1: i32) -> (i32, i32) {
    %c0_i32 = arith.constant 0 : i32
    %c0_i32_0 = arith.constant 0 : i32
    %c0_i32_1 = arith.constant 0 : i32
    return %c0_i32, %c0_i32_0 : i32, i32
  }
  func.func @transform_2(%arg0: i32, %arg1: i32) -> (i32, i32, i32) {
    %c0_i32 = arith.constant 0 : i32
    %c0_i32_0 = arith.constant 0 : i32
    %c0_i32_1 = arith.constant 0 : i32
    return %arg0, %c0_i32, %c0_i32_0 : i32, i32, i32
  }
  func.func @transform_3(%arg0: i32, %arg1: i32) -> (i32, i32, i32) {
    %c0_i32 = arith.constant 0 : i32
    %c0_i32_0 = arith.constant 0 : i32
    return %arg0, %c0_i32, %arg1 : i32, i32, i32
  }
}

</mosaic_0001>

<bundles_post_ra>
// kernel: tpu_custom_call.1
= control target key start
LH: loop header
LB: loop body
LE: loop exit
PB: predicated region body
PF: predicated region fallthrough
CT: control target
= control target key end

     0   :  { %8 = vsyncpa [#allocation3], 0  ;;  %s849_s0 = inlined_call_operand.hbm [shape: f32[2,32,128], index: 0, kind: input, shape index: {}]   ;;  %s850_s1 = inlined_call_operand.vmem [shape: f32[8,32], index: 1, kind: input, shape index: {}]   ;;  %s851_s2 = inlined_call_operand.vmem [shape: f32[2,8,1], index: 2, kind: input, shape index: {}]   ;;  %s852_s3 = inlined_call_operand.hbm [shape: f32[2,8,128], index: 3, kind: output, shape index: {}]  }
   0x1   :  { %10 = vsyncpa [#allocation3 + $0x1], 0 }
   0x2   :  { %11 = vsyncpa [#allocation4], 0 }
   0x3   :  { %13 = vsyncpa [#allocation4 + $0x1], 0  ;;  %s667_s12 = smov 0   ;;  %s669_s13 = smov 0  }
   0x4   :  { %s671_s14 = smov 0   ;;  %s673_s15 = smov 0  }
   0x5   :  { %s675_s16 = smov 0   ;;  %s677_s17 = smov 0  }
   0x6 LB: > { %s417_s18 = sadd.s32 4294967295, %s637_s17   ;;  %s418_s19 = sadd.s32 4294967294, %s637_s17   ;;  %s637_s17 = sphi %s677_s17, %s19_s17   ;;  %s633_s16 = sphi %s675_s16, %s867_s16   ;;  %s629_s15 = sphi %s673_s15, %s866_s15   ;;  %s625_s14 = sphi %s671_s14, %s865_s14   ;;  %s621_s13 = sphi %s669_s13, %s864_s13   ;;  %s617_s12 = sphi %s667_s12, %s863_s12  }
   0x7   : > { %s31_s20 = sadd.s32 1, %s633_s16  ;;  %s40_s21 = sadd.s32 1, %s625_s14 }
   0x8   : > { %p33_p0 = scmp.ge.s32.totalorder %s31_s20, 2  ;;  %p47_p1 = scmp.ne.s32.totalorder %s625_s14, %s621_s13 }
   0x9   : > { %p48_p2 = scmp.eq.s32.totalorder %s637_s17, 0  ;;  %p53_p3 = scmp.ne.s32.totalorder %s621_s13, %s617_s12 }
   0xa   : > { %s869_s20 = smov (%p33_p0, %s31_s20), 0  ;;  %p54_p5 = scmp.eq.s32.totalorder %s417_s18, 0 }
   0xb   : > { %p708_p4 = por %p48_p2, %p47_p1  ;;  %s35_s23 = ssub.s32 %s633_s16, %s869_s20 }
   0xc   : > { %p126_p6 = scmp.eq.s32.totalorder %s417_s18, 1  ;;  %p38_p7 = scmp.eq.s32.totalorder %s35_s23, 0 }
   0xd   : > { %p714_p8 = por %p54_p5, %p53_p3  ;;  %p132_p10 = scmp.eq.s32.totalorder %s418_s19, 1 }
   0xe   : > { %p718_p9 = por %p126_p6, %p47_p1  ;;  %p468_p13 = scmp.lt.s32.totalorder %s637_s17, 2 }
   0xf   : > { %s723_s26 = scalar_select %p38_p7, %s625_s14, %s40_s21  }
  0x10   : > { %s856_s25 = scalar_select %p718_p9, 1, 0 }
  0x11   : > { %p725_p11 = por %p132_p10, %p53_p3  ;;  %s155_s28 = sand.u32 1, %s625_s14  }
  0x12   : > { %s421_s29 = sshll.u32 %s155_s28, 5  ;;  %s433_s30 = sshll.u32 %s633_s16, 9 }
  0x13   : > { %s857_s27 = scalar_select %p725_p11, 1, 0 }
  0x14   : > { %s736_s6 = scalar_lea.hbm %s849_s0, %s433_s30  ;;  %s159_s7 = scalar_lea.vmem [#allocation2], %s421_s29 }
  0x15   : > { %s167_s8 = sshll.u32 %s159_s7, 4  ;;  %p742_p0 = pnand %p468_p13, %p708_p4  ;;  %s738_s8 = int_to_ptr.vmem [resolvable:$true] %s167_s8 }
  0x16   : > { %s747_s10 = scalar_lea.sflag [#allocation3], %s155_s28  ;;  %s525_s11 = scalar_lea.hbm %s736_s6, 512 }
  0x17   : > { %p526_p2 = scmp.ne.s32.totalorder %s736_s6, %s525_s11  ;;  %p527_p3 = pneg %p742_p0 }
  0x18   : > { %s530_s21 = scalar_lea.hbm %s849_s0, 1024  ;;  %p531_p4 = scmp.lt.u32.totalorder %s736_s6, %s849_s0 }
  0x19   : > { %p528_p5 = pnand %p527_p3, %p526_p2  ;;  %p532_p7 = scmp.lt.u32.totalorder %s530_s21, %s525_s11 }
  0x1a   : > { %p534_p13 = scmp.lt.u32.totalorder %s525_s11, %s736_s6 }
  0x1b   : > { %p529_p6 = pneg %p528_p5  ;;  %p533_p10 = por %p532_p7, %p531_p4 }
  0x1d   : > { %p535_p12 = por %p534_p13, %p533_p10 }
  0x1f   : > { %p536_p1 = pnand %p535_p12, %p529_p6 }
  0x21   : > { %539 = shalt.err (!%p536_p1)
}
  0x22   : > { %s540_s28 = scalar_lea.vmem %s738_s8, 512  ;;  %s639_s29 = smov [#allocation2]  }
  0x23   : > { %p541_p2 = scmp.ne.s32.totalorder %s738_s8, %s540_s28  ;;  %s545_s30 = sshll.u32 %s639_s29, 4  ;;  %s546_s30 = int_to_ptr.vmem [resolvable:$false] %s545_s30 }
  0x24   : > { %s547_s4 = scalar_lea.vmem %s546_s30, 1024  ;;  %p548_p9 = scmp.lt.s32.totalorder %s738_s8, %s546_s30 }
  0x25   : > { %p543_p5 = pnand %p541_p2, %p527_p3  ;;  %p549_p4 = scmp.lt.s32.totalorder %s547_s4, %s540_s28 }
  0x27   : > { %p544_p11 = pneg %p543_p5  ;;  %p550_p7 = por %p549_p4, %p548_p9 }
  0x29   : > { %p551_p10 = pnand %p550_p7, %p544_p11 }
  0x2b   : > { %554 = shalt.err (!%p551_p10)
}
  0x2c   : > { %s640_s5 = smov 128   ;;  %s641_s7 = smov 8  }
  0x2d   : > { %463 = dma.hbm_to_vmem [thread:$0]  (!%p742_p0), %s736_s6, 512, %s738_s8, %s747_s10, %s640_s5, %s640_s5, %s641_s7  }
  0x2e   : > { %p182_p12 = scmp.lt.s32.totalorder %s637_s17, 3  ;;  %p859_p1 = scmp.ge.s32.totalorder %s637_s17, 1 }
  0x30   : > { %p183_p3 = pnand %p859_p1, %p182_p12 }
  0x31   : > { %s779_s11 = sand.u32 (!%p183_p3), 1, %s621_s13  }
  0x32   : > { %186 = sbr.rel (%p183_p3) target bundleno = 297 (0x129), region = 32  ;;  %s425_s18 = sshll.u32 (!%p183_p3), %s779_s11, 5 }
  0x33   : > { %s189_s19 = scalar_lea.sflag (!%p183_p3), [#allocation3], %s779_s11  ;;  %s192_s21 = scalar_lea.vmem (!%p183_p3), [#allocation2], %s425_s18 }
  0x39   : > { %608 = dma.done.wait (%p714_p8), %s189_s19, 512  }
  0x3a   : > { %610 = vsyncadd (%p714_p8), %s189_s19, 4294966784  ;;  %p219_p9 = scmp.lt.s32.totalorder %s629_s15, 1  ;;  %v642_v0 = vmov 0.0|0.0   ;;  %vm643_vm0 = vmmov 0   ;;  %v644_v1 = vmov 0.0   ;;  %v645_v2 = vmov 0  }
  0x3b   : > { %450 = vmatprep.subr.bf16.mxu0 %v642_v0  ;;  %447 = vmatprep.mubr.msk.f32.mxu0 %vm643_vm0, %v644_v1  ;;  %v224_v3 = vld [vmem:[%s192_s21] sm:$0xff]  ;;  %v225_v4 = vld [vmem:[%s192_s21 + $0x8] sm:$0xff]  ;;  %v226_v5 = vld [vmem:[%s192_s21 + $0x10] sm:$0xff]  ;;  %vm234_vm1 = vcmask 261120   ;;  %s426_s28 = sshll.u32 %s779_s11, 3  ;;  %s430_s29 = sshll.u32 %s629_s15, 7 }
  0x3c   : > { %524 = vset.pattern.permute.xlu0 %v645_v2  ;;  %s220_s6 = scalar_select %p219_p9, %s629_s15, 1  ;;  %v451_v6 = vpack.c.bf16 %v225_v4, %v224_v3  ;;  %v227_v7 = vld [vmem:[%s192_s21 + $0x18] sm:$0xff]  ;;  %v223_v10 = vld [vmem:[%s850_s1] sm:$0xff] }
  0x3d   : > { %v454_v9 = vpack.c.bf16 %v227_v7, %v226_v5  ;;  %s218_s30 = scalar_lea.vmem [#allocation5], %s426_s28  ;;  %s800_s18 = scalar_lea.hbm %s852_s3, %s430_s29 }
  0x3e   : > { %s427_s8 = sshll.u32 %s220_s6, 3  ;;  %452 = vmatpush3.bf16.msra.mxu0 %v451_v6  ;;  %s324_s4 = sshll.u32 %s218_s30, 4  ;;  %s802_s4 = int_to_ptr.vmem [resolvable:$true] %s324_s4 }
  0x3f   : > { %s222_s22 = scalar_lea.vmem %s851_s2, %s427_s8  ;;  %453 = vmatprep.subr.bf16.mxu0 %v642_v0  ;;  %s310_s19 = scalar_lea.sflag [#allocation4], %s779_s11 }
  0x40   : > { %v228_v8 = vld [vmem:[%s222_s22] sm:$0xff]  ;;  %s555_s21 = scalar_lea.vmem %s802_s4, 128  ;;  %p860_p11 = scmp.ne.s32.totalorder %s856_s25, 0 }
  0x41   : > { %231 = vperm.xlu0 %524, %v228_v8   ;;  %p556_p8 = scmp.ne.s32.totalorder %s802_s4, %s555_s21  ;;  %s646_s15 = smov [#allocation5]  }
  0x42   : > { %455 = vmatpush3.bf16.msra.mxu0 %v454_v9  ;;  %s559_s6 = sshll.u32 %s646_s15, 4  ;;  %s560_s6 = int_to_ptr.vmem [resolvable:$false] %s559_s6 }
  0x43   : > { %p557_p0 = pnand %p556_p8, %p860_p11  ;;  %s561_s8 = scalar_lea.vmem %s560_s6, 256 }
  0x44   : > { %p562_p13 = scmp.lt.s32.totalorder %s802_s4, %s560_s6  ;;  %p563_p2 = scmp.lt.s32.totalorder %s561_s8, %s555_s21 }
  0x45   : > { %448 = vmatmul.mubr.msk.f32.vlgmr.msra.gmra.mrb[0].mxu0 %vm234_vm1, %v223_v10  ;;  %p558_p6 = pneg %p557_p0 }
  0x46   : > { %p564_p5 = por %p563_p2, %p562_p13 }
  0x48   : > { %p565_p4 = pnand %p564_p5, %p558_p6 }
  0xc0   : > { %v232_v11 = vpop.permute.xlu0 %231 }
 0x118   : > { %v304_v12 = vpop.f32.mrb[0].mxu0 }
 0x119   : > { %v305_v13 = vadd.f32 %v304_v12, %v232_v11  ;;  %v449_v14 = vpop.f32.mrb[1].mxu0 }
 0x11b   : > { %308 = vst [vmem:[%s218_s30] sm:$0xff] %v305_v13 }
 0x11c   : > { %568 = shalt.err (!%p565_p4)
}
 0x11d   : > { %s569_s11 = scalar_lea.hbm %s800_s18, 128  ;;  %s573_s22 = scalar_lea.hbm %s852_s3, 256 }
 0x11e   : > { %p570_p7 = scmp.ne.s32.totalorder %s800_s18, %s569_s11  ;;  %p574_p1 = scmp.lt.u32.totalorder %s800_s18, %s852_s3 }
 0x11f   : > { %p575_p3 = scmp.lt.u32.totalorder %s573_s22, %s569_s11  ;;  %p577_p8 = scmp.lt.u32.totalorder %s569_s11, %s800_s18 }
 0x120   : > { %p571_p10 = pnand %p570_p7, %p860_p11 }
 0x121   : > { %p576_p9 = por %p575_p3, %p574_p1 }
 0x122   : > { %p572_p12 = pneg %p571_p10 }
 0x123   : > { %p578_p0 = por %p577_p8, %p576_p9 }
 0x125   : > { %p579_p6 = pnand %p578_p0, %p572_p12 }
 0x127   : > { %582 = shalt.err (!%p579_p6)
}
 0x128   : > { %458 = dma.vmem_to_hbm [thread:$0]  (%p860_p11), %s802_s4, 128, %s800_s18, %s310_s19  }
 0x129 PF: > { %s336_s28 = sand.u32 1, %s617_s12   ;;  %p861_p13 = scmp.ne.s32.totalorder %s857_s27, 0 }
 0x12a   : > { %p862_p2 = scmp.ge.s32.totalorder %s637_s17, 2  ;;  %s337_s29 = scalar_lea.sflag [#allocation4], %s336_s28 }
 0x12c   : > { %p465_p5 = pnand %p862_p2, %p861_p13 }
 0x12e   : > { %612 = dma.done.wait (!%p465_p5), %s337_s29, 128  }
 0x12f   : > { %614 = vsyncadd (!%p465_p5), %s337_s29, 4294967168  ;;  %s19_s17 = sadd.s32 1, %s637_s17   ;;  %s863_s12 = smov %s621_s13 }
 0x130   : > { %p16_p4 = scmp.ge.s32.totalorder %s19_s17, 4   ;;  %s864_s13 = smov %s625_s14 }
 0x131   : > { %s865_s14 = smov %s723_s26  ;;  %s866_s15 = smov %s633_s16 }
 0x132   : > { %s867_s16 = smov %s869_s20  ;;  %18 = sbr.rel (!%p16_p4) target bundleno = 6 (0x6), region = 80 }
 0x139   :  { %342 = vsyncpa [#allocation3], 1 }
 0x13a   :  { %344 = vsyncpa [#allocation3 + $0x1], 1 }
 0x13b   :  { %345 = vsyncpa [#allocation4], 1 }
 0x13c   :  { %347 = vsyncpa [#allocation4 + $0x1], 1 }

</bundles_post_ra>
